<compile_context>
chip_gen: v6e
topology: v6e:2x2x1
jax: 0.10.0
libtpu: 0.0.40
codegen_flags: <defaults>
</compile_context>

<pallas_src>
import jax
import jax.numpy as jnp
import numpy as np
from jax import lax
from jax.experimental import pallas as pl
from jax.experimental.pallas import tpu as pltpu

BOARD_SIZE = 64
LANES = 128                      # two 64-wide boards per 128-lane vreg row
RANKS = "ABCDEFGH"
END_OF_GAME = "<eog>"            # sentinel token, mirrors clip_data_prep.END_OF_GAME

_TILE_MULT = 32                  # sublane rounding valid for f32 / bf16 / int8 blocks
_MAX_TILE_P = 8192               # 4 MiB f32 out per buffer; ~10 MiB double-buffered total
                                 #   -> fits v5e's 16 MiB scoped-VMEM default
_MAX_TILE_P_V7X = 16384          # ~20 MiB double-buffered, re-derived for v7x (64 MiB VMEM)
_FAST_PATH_MAX_B = 4096          # below this, pallas launch/padding overhead dominates


def _chip_tuning():
    """(max packed-row tile, dimension_semantics) per TPU generation."""
    try:
        kind = jax.devices()[0].device_kind.lower()
    except Exception:  # pragma: no cover - defensive; keep kernel usable anywhere
        kind = ""
    if "v7" in kind or "7x" in kind:
        # v7x: 2 TensorCores per chip -> split the batch grid across them, bigger tile
        # to reach the same roofline fraction at ~3.2 TB/s HBM.
        return _MAX_TILE_P_V7X, (pltpu.CORE_PARALLEL,)
    return _MAX_TILE_P, ("parallel",)


# ----------------------------------------------------------------------------
# Pallas kernel: batched one-hot board encoding, two boards packed per 128 lanes
# ----------------------------------------------------------------------------
def _one_hot_kernel(tgt_ref, out_ref):
    # tgt_ref: (TP, 2) int8  -- precomputed target lane per packed slot:
    #                           slot 0 in [0,63] (-1 = END_OF_GAME),
    #                           slot 1 in [64,127] (-1 = END_OF_GAME).
    # out_ref: (TP, 128)     -- two one-hot boards per row, lane-dense unmasked store.
    t = tgt_ref[...].astype(jnp.int32)                               # (TP, 2)
    lanes = lax.broadcasted_iota(jnp.int32, out_ref.shape, 1)        # (TP, 128)
    hit = (lanes == t[:, 0:1]) | (lanes == t[:, 1:2])                # -1 never matches
    out_ref[...] = hit.astype(out_ref.dtype)


def _one_hot_xla(idx, out_dtype):
    """Fused XLA fast path for small batches (idx already sanitised to [-1, 0..63])."""
    lanes = lax.broadcasted_iota(jnp.int32, (idx.shape[0], BOARD_SIZE), 1)
    return (lanes == idx[:, None]).astype(out_dtype)


def text_encoder_pallas(move_indices: jax.Array,
                        out_dtype=jnp.float32,
                        *,
                        min_pallas_batch: int = _FAST_PATH_MAX_B,
                        return_packed: bool = False) -> jax.Array:
    """move_indices: int array of shape (B,), values in [0,63] or -1 (END_OF_GAME).

    Returns (B, 64) one-hot boards in `out_dtype` (float32 by default, matching
    torch.FloatTensor). With return_packed=True the raw (ceil(B/2)_padded, 128) kernel
    output is returned instead (row r = moves 2r | 2r+1), avoiding the (P,128)->(B,64)
    relayout; padded rows are all-zero.
    """
    idx = jnp.asarray(move_indices, dtype=jnp.int32).reshape(-1)
    # Sanitise: anything outside the board maps to the END_OF_GAME sentinel (-1).
    idx = jnp.where((idx >= 0) & (idx < BOARD_SIZE), idx, -1)
    b = idx.shape[0]

    # Small-batch fast path: a fused elementwise compare beats a pallas_call launch.
    if b < min_pallas_batch and not return_packed:
        return _one_hot_xla(idx, out_dtype)

    max_tile_p, dim_sem = _chip_tuning()

    # Pack two moves per 128-lane output row; pad packed rows to a 32-sublane-aligned
    # tile (valid minimum tile for f32 / bf16 / int8 output blocks and the int8 input).
    p = pl.cdiv(b, 2)
    tile_p = min(max_tile_p, pl.cdiv(p, _TILE_MULT) * _TILE_MULT)
    p_pad = pl.cdiv(p, tile_p) * tile_p
    b_pad = 2 * p_pad
    if b_pad != b:
        idx = jnp.concatenate([idx, jnp.full((b_pad - b,), -1, jnp.int32)])

    # Precompute target lanes: even moves hit lanes 0..63, odd moves lanes 64..127.
    # Sentinel is mapped to -1 BEFORE the +64 offset (so EOG never hits lane 63).
    lane_off = (jnp.arange(b_pad, dtype=jnp.int32) & 1) * BOARD_SIZE
    targets = jnp.where(idx < 0, -1, idx + lane_off).astype(jnp.int8)   # values -1..127
    targets = targets.reshape(p_pad, 2)

    packed = pl.pallas_call(
        _one_hot_kernel,
        out_shape=jax.ShapeDtypeStruct((p_pad, LANES), out_dtype),
        grid=(p_pad // tile_p,),
        in_specs=[pl.BlockSpec((tile_p, 2), lambda i: (i, 0))],
        out_specs=pl.BlockSpec((tile_p, LANES), lambda i: (i, 0)),
        compiler_params=pltpu.CompilerParams(
            dimension_semantics=dim_sem,
            vmem_limit_bytes=32 * 1024 * 1024),
    )(targets)

    if return_packed:
        return packed

    # (P, 128) -> (2P, 64): row 2r = lanes 0..63, row 2r+1 = lanes 64..127; trim padding.
    # TODO(synk): this reshape changes the TPU tiled layout (64-lane minor dim); prefer
    # return_packed=True (or fuse into the consumer) on hot paths to skip the relayout.
    return packed.reshape(b_pad, BOARD_SIZE)[:b]


# ----------------------------------------------------------------------------
# Host-side glue: parse move strings ("A1".."H8" / END_OF_GAME) into indices.
# Mirrors common.get_move_coords(move): row from rank letter, col from digit.
# ----------------------------------------------------------------------------
def encode_move(move: str) -> int:
    if move == END_OF_GAME:
        return -1
    row = RANKS.index(move[0].upper())
    col = int(move[1]) - 1
    return row * 8 + col


def text_encoder_forward(moves, out_dtype=jnp.float32, **kwargs):
    """moves: list of move strings -> (B, 64) array, each row matching the
    PyTorch TextEncoder.forward output for that move."""
    idx = jnp.array([encode_move(m) for m in moves], dtype=jnp.int32)
    return text_encoder_pallas(idx, out_dtype=out_dtype, **kwargs)


# ----------------------------------------------------------------------------
if __name__ == "__main__":
    # Deterministic inputs: sample move indices with PRNGKey(0) plus END_OF_GAME sentinel.
    key = jax.random.PRNGKey(0)
    rand_idx = jax.random.randint(key, (15,), 0, 64)
    moves = [RANKS[int(v) // 8] + str(int(v) % 8 + 1) for v in rand_idx] + [END_OF_GAME]

    # Reference per the PyTorch semantics.
    ref = np.zeros((len(moves), BOARD_SIZE), dtype=np.float32)
    for i, m in enumerate(moves):
        v = encode_move(m)
        if v >= 0:
            ref[i, v] = 1.0

    # 1) Force the Pallas path (small batch would otherwise take the XLA fast path).
    out_pallas = text_encoder_forward(moves, min_pallas_batch=0)
    out_pallas = jax.block_until_ready(out_pallas)
    assert out_pallas.shape == (len(moves), BOARD_SIZE)
    assert out_pallas.dtype == jnp.float32
    np.testing.assert_allclose(np.asarray(out_pallas), ref, atol=0, rtol=0)

    # 2) Packed-layout output (consumer-side unpack must match).
    packed = jax.block_until_ready(
        text_encoder_forward(moves, min_pallas_batch=0, return_packed=True))
    unpacked = np.asarray(packed).reshape(-1, BOARD_SIZE)[:len(moves)]
    np.testing.assert_allclose(unpacked, ref, atol=0, rtol=0)

    # 3) Small-batch XLA fast path must match too.
    out_fast = jax.block_until_ready(text_encoder_forward(moves))
    np.testing.assert_allclose(np.asarray(out_fast), ref, atol=0, rtol=0)

    print("KERNEL_OK")
</pallas_src>

<mosaic_0001>
module attributes {stable_mosaic.version = 11 : i64} {
  func.func @_one_hot_kernel(%arg0: i32, %arg1: memref<32x2xi8, #tpu.memory_space<vmem>>, %arg2: memref<32x128xf32, #tpu.memory_space<vmem>>) attributes {dimension_semantics = [#tpu.dimension_semantics<parallel>], iteration_bounds = array<i64: 1>, scalar_prefetch = 0 : i64, scratch_operands = 0 : i64, tpu.core_type = #tpu.core_type<tc>, window_params = [{transform_indices = @transform_0, window_bounds = array<i64: 32, 2>}, {transform_indices = @transform_1, window_bounds = array<i64: 32, 128>}]} {
    %c0 = arith.constant 0 : index
    %c0_0 = arith.constant 0 : index
    %0 = vector.load %arg1[%c0, %c0_0] : memref<32x2xi8, #tpu.memory_space<vmem>>, vector<32x2xi8>
    %1 = arith.extsi %0 : vector<32x2xi8> to vector<32x2xi32>
    %2 = tpu.iota {dimensions = array<i32: 1>} : vector<32x128xi32>
    %3 = vector.extract_strided_slice %1 {offsets = [0, 0], sizes = [32, 1], strides = [1, 1]} : vector<32x2xi32> to vector<32x1xi32>
    %4 = vector.broadcast %3 : vector<32x1xi32> to vector<32x128xi32>
    %5 = arith.cmpi eq, %2, %4 : vector<32x128xi32>
    %6 = vector.extract_strided_slice %1 {offsets = [0, 1], sizes = [32, 1], strides = [1, 1]} : vector<32x2xi32> to vector<32x1xi32>
    %7 = vector.broadcast %6 : vector<32x1xi32> to vector<32x128xi32>
    %8 = arith.cmpi eq, %2, %7 : vector<32x128xi32>
    %9 = arith.ori %5, %8 : vector<32x128xi1>
    %10 = arith.extui %9 : vector<32x128xi1> to vector<32x128xi32>
    %11 = arith.sitofp %10 : vector<32x128xi32> to vector<32x128xf32>
    %c0_1 = arith.constant 0 : index
    %c0_2 = arith.constant 0 : index
    %12 = vector.load %arg2[%c0_1, %c0_2] : memref<32x128xf32, #tpu.memory_space<vmem>>, vector<32x128xf32>
    tpu.vector_store %arg2[%c0_1, %c0_2], %11 {strides = array<i32>} : memref<32x128xf32, #tpu.memory_space<vmem>>, vector<32x128xf32>,
    return
  }
  func.func @transform_0(%arg0: i32) -> (i32, i32) {
    %c0_i32 = arith.constant 0 : i32
    %c0_i32_0 = arith.constant 0 : i32
    return %arg0, %c0_i32 : i32, i32
  }
  func.func @transform_1(%arg0: i32) -> (i32, i32) {
    %c0_i32 = arith.constant 0 : i32
    %c0_i32_0 = arith.constant 0 : i32
    return %arg0, %c0_i32 : i32, i32
  }
}

</mosaic_0001>

<bundles_post_ra>
// kernel: tpu_custom_call.1
= control target key start
LH: loop header
LB: loop body
LE: loop exit
PB: predicated region body
PF: predicated region fallthrough
CT: control target
= control target key end

     0   :  { %s150_s0 = inlined_call_operand.vmem [shape: s8[32,2], index: 0, kind: input, shape index: {}]   ;;  %s151_s1 = inlined_call_operand.hbm [shape: f32[32,128], index: 1, kind: output, shape index: {}]  }
   0x1   :  { %v95_v0 = vld [vmem:[%s150_s0] sm:$0xff]  }
   0x2   :  { %6 = vsyncpa [#allocation3], 0  ;;  %v128_v1 = vmov 0   ;;  %v93_v2 = vunpack.c.2.s8 %v95_v0  ;;  %v89_v3 = vunpack.c.0.s8 %v95_v0  ;;  %v94_v4 = vunpack.c.3.s8 %v95_v0  ;;  %s131_s0 = smov [#allocation2]  }
   0x3   :  { %103 = vset.pattern.permute.xlu1 %v128_v1  ;;  %102 = vset.pattern.permute.xlu0 %v128_v1  ;;  %v90_v5 = vunpack.c.1.s8 %v95_v0  ;;  %v129_v6 = vmov 1   ;;  %v17_v9 = vlaneseq  ;;  %v130_v15 = vmov 0.0   ;;  %s72_s8 = sshll.u32 %s131_s0, 4  ;;  %s73_s8 = int_to_ptr.vmem [resolvable:$true] %s72_s8 }
   0x4   :  { %26 = vperm.xlu1 %103, %v93_v2   ;;  %20 = vperm.xlu0 %102, %v89_v3   ;;  %s106_s9 = scalar_lea.vmem %s73_s8, 512  ;;  %p111_p1 = scmp.lt.s32.totalorder %s73_s8, %s73_s8 }
   0x5   :  { %v18_v12 = vand.u32 127, %v17_v9  ;;  %p107_p0 = scmp.ne.s32.totalorder %s73_s8, %s106_s9  ;;  %p112_p2 = scmp.lt.s32.totalorder %s106_s9, %s106_s9 }
   0x7   :  { %p113_p3 = por %p112_p2, %p111_p1 }
   0x8   :  { %29 = vperm.xlu1 %103, %v94_v4   ;;  %23 = vperm.xlu0 %102, %v90_v5  }
   0x9   :  { %p114_p4 = pnand %p113_p3, %p107_p0 }
   0xc   :  { %105 = vset.pattern.permute.xlu1 %v129_v6  ;;  %104 = vset.pattern.permute.xlu0 %v129_v6 }
   0xd   :  { %39 = vperm.xlu1 %105, %v90_v5   ;;  %36 = vperm.xlu0 %104, %v89_v3  }
  0x11   :  { %42 = vperm.xlu1 %105, %v93_v2   ;;  %45 = vperm.xlu0 %104, %v94_v4  }
  0x7f   :  { %v27_v7 = vpop.permute.xlu1 %26  ;;  %v21_v8 = vpop.permute.xlu0 %20 }
  0x80   :  { %vm31_vm3 = vcmp.eq.s32.totalorder %v18_v12, %v21_v8  ;;  %vm33_vm6 = vcmp.eq.s32.totalorder %v18_v12, %v27_v7 }
  0x83   :  { %v30_v10 = vpop.permute.xlu1 %29  ;;  %v24_v11 = vpop.permute.xlu0 %23 }
  0x84   :  { %vm32_vm0 = vcmp.eq.s32.totalorder %v18_v12, %v24_v11  ;;  %vm34_vm9 = vcmp.eq.s32.totalorder %v18_v12, %v30_v10 }
  0x88   :  { %v40_v13 = vpop.permute.xlu1 %39  ;;  %v37_v14 = vpop.permute.xlu0 %36 }
  0x89   :  { %vm48_vm1 = vcmp.eq.s32.totalorder %v18_v12, %v40_v13  ;;  %vm47_vm2 = vcmp.eq.s32.totalorder %v18_v12, %v37_v14 }
  0x8a   :  { %vm52_vm4 = vmor %vm32_vm0, %vm48_vm1 }
  0x8b   :  { %v84_v16 = vsel %vm52_vm4, 1.0, %v130_v15  ;;  %vm51_vm5 = vmor %vm31_vm3, %vm47_vm2 }
  0x8c   :  { %64 = vst [vmem:[#allocation2 + $0x8] sm:$0xff] %v84_v16  ;;  %v83_v17 = vsel %vm51_vm5, 1.0, %v130_v15  ;;  %v43_v18 = vpop.permute.xlu1 %42  ;;  %v46_v19 = vpop.permute.xlu0 %45 }
  0x8d   :  { %63 = vst [vmem:[#allocation2] sm:$0xff] %v83_v17  ;;  %vm49_vm7 = vcmp.eq.s32.totalorder %v18_v12, %v43_v18  ;;  %vm50_vm8 = vcmp.eq.s32.totalorder %v18_v12, %v46_v19 }
  0x8e   :  { %vm53_vm10 = vmor %vm33_vm6, %vm49_vm7 }
  0x8f   :  { %v85_v20 = vsel %vm53_vm10, 1.0, %v130_v15  ;;  %vm54_vm11 = vmor %vm34_vm9, %vm50_vm8 }
  0x90   :  { %65 = vst [vmem:[#allocation2 + $0x10] sm:$0xff] %v85_v20  ;;  %v86_v21 = vsel %vm54_vm11, 1.0, %v130_v15 }
  0x91   :  { %66 = vst [vmem:[#allocation2 + $0x18] sm:$0xff] %v86_v21 }
  0x92   :  { %117 = shalt.err (!%p114_p4)
}
  0x93   :  { %s132_s10 = smov 128   ;;  %s133_s11 = smov 8  }
  0x94   :  { %78 = dma.vmem_to_hbm [thread:$0]  %s73_s8, 512, %s151_s1, [#allocation3], %s132_s10, %s132_s10, %s133_s11  }
  0x95   :  { %126 = dma.done.wait [#allocation3], 512  }
  0x96   :  { %127 = vsyncadd [#allocation3], 4294966784 }
  0x97   :  { %82 = vsyncpa [#allocation3], 1 }

</bundles_post_ra>
